<compile_context>
chip_gen: v7x
topology: tpu7x:2x2x1
jax: 0.10.0
libtpu: 0.0.40
codegen_flags: <defaults>
</compile_context>

<pallas_src>
import functools

import jax
import jax.numpy as jnp
from jax import lax
from jax.experimental import pallas as pl
from jax.experimental.pallas import tpu as pltpu

KH = KW = 3
PAD = KH // 2
NEG_SLOPE = 0.1
BN_EPS = 1e-5


def _conv_stats_kernel(h, w, x_ref, w_ref, y_ref, sum_ref, ssq_ref, patch_ref):
    """3x3 conv for one batch element + per-batch per-channel sum / sum-sq.

    x_ref    : (1, Cin, H*W)      flat-spatial input (lane axis = H*W)
    w_ref    : (Cout, 9*Cin)      weights, K ordered as (kh, kw, cin)
    y_ref    : (1, Cout, H*W)     conv output (lane-dense)
    sum_ref  : (1, Cout, 1)       per-batch sum over spatial
    ssq_ref  : (1, Cout, 1)       per-batch sum of squares over spatial
    patch_ref: (9*Cin, H*W)       VMEM scratch: im2col operand for one matmul
    """
    cin = x_ref.shape[1]
    hw = h * w
    x = x_ref[0]                                            # (Cin, HW) f32

    # Column index j of each flat spatial position p = i*W + j (hoisted).
    col = lax.broadcasted_iota(jnp.int32, (cin, hw), 1) % w
    # Source columns that would wrap across a row boundary for dw = +1 / -1.
    x_dwp = jnp.where(col >= 1, x, 0.0)        # used by taps with dw = +1
    x_dwm = jnp.where(col < w - 1, x, 0.0)     # used by taps with dw = -1

    # Zero once; only boundary strips stay zero after the tap writes below.
    patch_ref[...] = jnp.zeros_like(patch_ref)

    for kh in range(KH):                                    # static 3x3 loop
        for kw in range(KW):
            dh, dw = kh - PAD, kw - PAD
            off = dh * w + dw                               # flat lane shift
            src = x if dw == 0 else (x_dwp if dw == 1 else x_dwm)
            r0 = (kh * KW + kw) * cin
            if off > 0:
                patch_ref[r0:r0 + cin, 0:hw - off] = src[:, off:]
            elif off < 0:
                patch_ref[r0:r0 + cin, -off:hw] = src[:, :hw + off]
            else:
                patch_ref[r0:r0 + cin, :] = src

    # One MXU push: (Cout, 9*Cin) x (9*Cin, H*W) -> (Cout, H*W), f32 accumulate.
    acc = jnp.dot(w_ref[...], patch_ref[...],
                  preferred_element_type=jnp.float32)

    y_ref[0] = acc.astype(y_ref.dtype)
    sum_ref[...] = jnp.sum(acc, axis=1, keepdims=True)[None]
    ssq_ref[...] = jnp.sum(acc * acc, axis=1, keepdims=True)[None]


def _bn_lrelu_kernel(y_ref, scale_ref, shift_ref, o_ref):
    # y_ref/o_ref: (tr, H*W) f32 lane-dense slabs; scale/shift: (tr, 1) affine.
    z = y_ref[...] * scale_ref[...] + shift_ref[...]
    o_ref[...] = jnp.where(z >= 0, z, NEG_SLOPE * z)


@jax.jit
def conv_bn_leaky_relu(x_nchw, weight_oihw, gamma, beta):
    N, Cin, H, W = x_nchw.shape
    Cout = weight_oihw.shape[0]
    HW = H * W
    KK = KH * KW * Cin

    # Free, contiguous reshapes only — no pad / transpose HBM passes.
    x2d = x_nchw.reshape(N, Cin, HW)
    # OIHW -> (Cout, KH*KW*Cin), K ordered (kh, kw, cin). Tiny one-time op.
    w2d = jnp.transpose(weight_oihw, (0, 2, 3, 1)).reshape(Cout, KK)

    conv_flat, psum, pssq = pl.pallas_call(
        functools.partial(_conv_stats_kernel, H, W),
        out_shape=(
            jax.ShapeDtypeStruct((N, Cout, HW), jnp.float32),
            jax.ShapeDtypeStruct((N, Cout, 1), jnp.float32),
            jax.ShapeDtypeStruct((N, Cout, 1), jnp.float32),
        ),
        grid=(N,),
        in_specs=[
            pl.BlockSpec((1, Cin, HW), lambda b: (b, 0, 0)),
            pl.BlockSpec((Cout, KK), lambda b: (0, 0)),
        ],
        out_specs=(
            pl.BlockSpec((1, Cout, HW), lambda b: (b, 0, 0)),
            pl.BlockSpec((1, Cout, 1), lambda b: (b, 0, 0)),
            pl.BlockSpec((1, Cout, 1), lambda b: (b, 0, 0)),
        ),
        scratch_shapes=[pltpu.VMEM((KK, HW), jnp.float32)],
        compiler_params=pltpu.CompilerParams(
            dimension_semantics=("parallel",)),   # no cross-grid accumulation
    )(x2d, w2d)

    # BatchNorm2d training-mode batch stats (biased variance) over (N, H, W).
    n_total = jnp.float32(N * HW)
    csum = jnp.sum(psum[:, :, 0], axis=0)            # (Cout,)
    cssq = jnp.sum(pssq[:, :, 0], axis=0)
    mean = csum / n_total
    var = cssq / n_total - mean * mean
    inv_std = lax.rsqrt(var + BN_EPS)
    scale = gamma * inv_std                          # (Cout,)
    shift = beta - mean * scale

    # Fused BN-affine + LeakyReLU over lane-dense (N*Cout, H*W) slabs.
    rows = N * Cout
    y2d = conv_flat.reshape(rows, HW)                # free reshape
    scale_r = jnp.tile(scale, (N,)).reshape(rows, 1)
    shift_r = jnp.tile(shift, (N,)).reshape(rows, 1)

    tr = min(rows, 512)                              # large row tile
    if rows % tr:
        tr = rows

    out2d = pl.pallas_call(
        _bn_lrelu_kernel,
        out_shape=jax.ShapeDtypeStruct((rows, HW), jnp.float32),
        grid=(rows // tr,),
        in_specs=[
            pl.BlockSpec((tr, HW), lambda r: (r, 0)),
            pl.BlockSpec((tr, 1), lambda r: (r, 0)),
            pl.BlockSpec((tr, 1), lambda r: (r, 0)),
        ],
        out_specs=pl.BlockSpec((tr, HW), lambda r: (r, 0)),
        compiler_params=pltpu.CompilerParams(
            dimension_semantics=("parallel",)),
        input_output_aliases={0: 0},                 # reuse conv buffer in place
    )(y2d, scale_r, shift_r)

    return out2d.reshape(N, Cout, H, W)              # free reshape back to NCHW


def _reference(x_nchw, w_oihw, gamma, beta):
    y = lax.conv_general_dilated(
        x_nchw, w_oihw, window_strides=(1, 1),
        padding=((PAD, PAD), (PAD, PAD)),
        dimension_numbers=("NCHW", "OIHW", "NCHW"))
    mean = jnp.mean(y, axis=(0, 2, 3), keepdims=True)
    var = jnp.var(y, axis=(0, 2, 3), keepdims=True)      # biased, like BN training
    z = (y - mean) * lax.rsqrt(var + BN_EPS)
    z = z * gamma.reshape(1, -1, 1, 1) + beta.reshape(1, -1, 1, 1)
    return jnp.where(z >= 0, z, NEG_SLOPE * z)


if __name__ == "__main__":
    key = jax.random.PRNGKey(0)
    kx, kw, kg, kb = jax.random.split(key, 4)

    N, Cin, H, W = 2, 4, 16, 16
    Cout = 8

    x = jax.random.normal(kx, (N, Cin, H, W), jnp.float32)
    weight = 0.1 * jax.random.normal(kw, (Cout, Cin, KH, KW), jnp.float32)
    gamma = 1.0 + 0.1 * jax.random.normal(kg, (Cout,), jnp.float32)
    beta = 0.1 * jax.random.normal(kb, (Cout,), jnp.float32)

    out = conv_bn_leaky_relu(x, weight, gamma, beta)
    out = jax.block_until_ready(out)

    ref = _reference(x, weight, gamma, beta)
    assert out.shape == (N, Cout, H, W)
    err = float(jnp.max(jnp.abs(out - ref)))
    assert err < 2e-4, f"mismatch vs reference: {err}"
    print("KERNEL_OK")
</pallas_src>

<mosaic_0001>
module attributes {stable_mosaic.version = 11 : i64} {
  func.func @_conv_stats_kernel(%arg0: i32, %arg1: memref<1x4x256xf32, #tpu.memory_space<vmem>>, %arg2: memref<8x36xf32, #tpu.memory_space<vmem>>, %arg3: memref<1x8x256xf32, #tpu.memory_space<vmem>>, %arg4: memref<1x8x1xf32, #tpu.memory_space<vmem>>, %arg5: memref<1x8x1xf32, #tpu.memory_space<vmem>>, %arg6: memref<36x256xf32, #tpu.memory_space<vmem>>) attributes {dimension_semantics = [#tpu.dimension_semantics<parallel>], iteration_bounds = array<i64: 2>, scalar_prefetch = 0 : i64, scratch_operands = 1 : i64, tpu.core_type = #tpu.core_type<tc>, window_params = [{transform_indices = @transform_0, window_bounds = array<i64: 1, 4, 256>}, {pipeline_mode = #tpu.pipeline_mode<synchronous>, transform_indices = @transform_1, window_bounds = array<i64: 8, 36>}, {transform_indices = @transform_2, window_bounds = array<i64: 1, 8, 256>}, {transform_indices = @transform_3, window_bounds = array<i64: 1, 8, 1>}, {transform_indices = @transform_4, window_bounds = array<i64: 1, 8, 1>}]} {
    %c0 = arith.constant 0 : index
    %c0_0 = arith.constant 0 : index
    %c0_1 = arith.constant 0 : index
    %0 = vector.load %arg1[%c0, %c0_0, %c0_1] : memref<1x4x256xf32, #tpu.memory_space<vmem>>, vector<1x4x256xf32>
    %1 = vector.shape_cast %0 : vector<1x4x256xf32> to vector<4x256xf32>
    %2 = tpu.iota {dimensions = array<i32: 1>} : vector<4x256xi32>
    %c16_i32 = arith.constant 16 : i32
    %c0_i32 = arith.constant 0 : i32
    %3 = arith.cmpi eq, %c16_i32, %c0_i32 : i32
    %c1_i32 = arith.constant 1 : i32
    %4 = arith.select %3, %c1_i32, %c16_i32 : i32
    %5 = vector.broadcast %4 : i32 to vector<4x256xi32>
    %6 = arith.remsi %2, %5 : vector<4x256xi32>
    %c0_i32_2 = arith.constant 0 : i32
    %7 = vector.broadcast %c0_i32_2 : i32 to vector<4x256xi32>
    %8 = arith.cmpi ne, %6, %7 : vector<4x256xi32>
    %c0_i32_3 = arith.constant 0 : i32
    %9 = vector.broadcast %c0_i32_3 : i32 to vector<4x256xi32>
    %10 = arith.cmpi slt, %6, %9 : vector<4x256xi32>
    %c0_i32_4 = arith.constant 0 : i32
    %11 = arith.cmpi slt, %4, %c0_i32_4 : i32
    %12 = vector.broadcast %11 : i1 to vector<4x256xi1>
    %13 = vector.broadcast %12 : vector<4x256xi1> to vector<4x256xi1>
    %14 = arith.xori %10, %13 : vector<4x256xi1>
    %15 = arith.andi %14, %8 : vector<4x256xi1>
    %16 = vector.broadcast %4 : i32 to vector<4x256xi32>
    %17 = arith.addi %6, %16 : vector<4x256xi32>
    %18 = arith.select %15, %17, %6 : vector<4x256xi1>, vector<4x256xi32>
    %c1_i32_5 = arith.constant 1 : i32
    %19 = vector.broadcast %c1_i32_5 : i32 to vector<4x256xi32>
    %20 = arith.cmpi sge, %18, %19 : vector<4x256xi32>
    %cst = arith.constant 0.000000e+00 : f32
    %21 = vector.broadcast %cst : f32 to vector<4x256xf32>
    %22 = arith.select %20, %1, %21 : vector<4x256xi1>, vector<4x256xf32>
    %c15_i32 = arith.constant 15 : i32
    %23 = vector.broadcast %c15_i32 : i32 to vector<4x256xi32>
    %24 = arith.cmpi slt, %18, %23 : vector<4x256xi32>
    %cst_6 = arith.constant 0.000000e+00 : f32
    %25 = vector.broadcast %cst_6 : f32 to vector<4x256xf32>
    %26 = arith.select %24, %1, %25 : vector<4x256xi1>, vector<4x256xf32>
    %cst_7 = arith.constant 0.000000e+00 : f32
    %27 = vector.broadcast %cst_7 : f32 to vector<36x256xf32>
    %c0_8 = arith.constant 0 : index
    %c0_9 = arith.constant 0 : index
    %28 = vector.load %arg6[%c0_8, %c0_9] : memref<36x256xf32, #tpu.memory_space<vmem>>, vector<36x256xf32>
    tpu.vector_store %arg6[%c0_8, %c0_9], %27 {strides = array<i32>} : memref<36x256xf32, #tpu.memory_space<vmem>>, vector<36x256xf32>,
    %29 = vector.extract_strided_slice %26 {offsets = [0, 0], sizes = [4, 239], strides = [1, 1]} : vector<4x256xf32> to vector<4x239xf32>
    %c0_10 = arith.constant 0 : index
    %c17 = arith.constant 17 : index
    %30 = vector.load %arg6[%c0_10, %c17] : memref<36x256xf32, #tpu.memory_space<vmem>>, vector<4x239xf32>
    tpu.vector_store %arg6[%c0_10, %c17], %29 {strides = array<i32>} : memref<36x256xf32, #tpu.memory_space<vmem>>, vector<4x239xf32>,
    %31 = vector.extract_strided_slice %1 {offsets = [0, 0], sizes = [4, 240], strides = [1, 1]} : vector<4x256xf32> to vector<4x240xf32>
    %c4 = arith.constant 4 : index
    %c16 = arith.constant 16 : index
    %32 = vector.load %arg6[%c4, %c16] : memref<36x256xf32, #tpu.memory_space<vmem>>, vector<4x240xf32>
    tpu.vector_store %arg6[%c4, %c16], %31 {strides = array<i32>} : memref<36x256xf32, #tpu.memory_space<vmem>>, vector<4x240xf32>,
    %33 = vector.extract_strided_slice %22 {offsets = [0, 0], sizes = [4, 241], strides = [1, 1]} : vector<4x256xf32> to vector<4x241xf32>
    %c8 = arith.constant 8 : index
    %c15 = arith.constant 15 : index
    %34 = vector.load %arg6[%c8, %c15] : memref<36x256xf32, #tpu.memory_space<vmem>>, vector<4x241xf32>
    tpu.vector_store %arg6[%c8, %c15], %33 {strides = array<i32>} : memref<36x256xf32, #tpu.memory_space<vmem>>, vector<4x241xf32>,
    %35 = vector.extract_strided_slice %26 {offsets = [0, 0], sizes = [4, 255], strides = [1, 1]} : vector<4x256xf32> to vector<4x255xf32>
    %c12 = arith.constant 12 : index
    %c1 = arith.constant 1 : index
    %36 = vector.load %arg6[%c12, %c1] : memref<36x256xf32, #tpu.memory_space<vmem>>, vector<4x255xf32>
    tpu.vector_store %arg6[%c12, %c1], %35 {strides = array<i32>} : memref<36x256xf32, #tpu.memory_space<vmem>>, vector<4x255xf32>,
    %c16_11 = arith.constant 16 : index
    %c0_12 = arith.constant 0 : index
    %37 = vector.load %arg6[%c16_11, %c0_12] : memref<36x256xf32, #tpu.memory_space<vmem>>, vector<4x256xf32>
    tpu.vector_store %arg6[%c16_11, %c0_12], %1 {strides = array<i32>} : memref<36x256xf32, #tpu.memory_space<vmem>>, vector<4x256xf32>,
    %38 = vector.extract_strided_slice %22 {offsets = [0, 1], sizes = [4, 255], strides = [1, 1]} : vector<4x256xf32> to vector<4x255xf32>
    %c20 = arith.constant 20 : index
    %c0_13 = arith.constant 0 : index
    %39 = vector.load %arg6[%c20, %c0_13] : memref<36x256xf32, #tpu.memory_space<vmem>>, vector<4x255xf32>
    tpu.vector_store %arg6[%c20, %c0_13], %38 {strides = array<i32>} : memref<36x256xf32, #tpu.memory_space<vmem>>, vector<4x255xf32>,
    %40 = vector.extract_strided_slice %26 {offsets = [0, 15], sizes = [4, 241], strides = [1, 1]} : vector<4x256xf32> to vector<4x241xf32>
    %c24 = arith.constant 24 : index
    %c0_14 = arith.constant 0 : index
    %41 = vector.load %arg6[%c24, %c0_14] : memref<36x256xf32, #tpu.memory_space<vmem>>, vector<4x241xf32>
    tpu.vector_store %arg6[%c24, %c0_14], %40 {strides = array<i32>} : memref<36x256xf32, #tpu.memory_space<vmem>>, vector<4x241xf32>,
    %42 = vector.extract_strided_slice %1 {offsets = [0, 16], sizes = [4, 240], strides = [1, 1]} : vector<4x256xf32> to vector<4x240xf32>
    %c28 = arith.constant 28 : index
    %c0_15 = arith.constant 0 : index
    %43 = vector.load %arg6[%c28, %c0_15] : memref<36x256xf32, #tpu.memory_space<vmem>>, vector<4x240xf32>
    tpu.vector_store %arg6[%c28, %c0_15], %42 {strides = array<i32>} : memref<36x256xf32, #tpu.memory_space<vmem>>, vector<4x240xf32>,
    %44 = vector.extract_strided_slice %22 {offsets = [0, 17], sizes = [4, 239], strides = [1, 1]} : vector<4x256xf32> to vector<4x239xf32>
    %c32 = arith.constant 32 : index
    %c0_16 = arith.constant 0 : index
    %45 = vector.load %arg6[%c32, %c0_16] : memref<36x256xf32, #tpu.memory_space<vmem>>, vector<4x239xf32>
    tpu.vector_store %arg6[%c32, %c0_16], %44 {strides = array<i32>} : memref<36x256xf32, #tpu.memory_space<vmem>>, vector<4x239xf32>,
    %c0_17 = arith.constant 0 : index
    %c0_18 = arith.constant 0 : index
    %46 = vector.load %arg2[%c0_17, %c0_18] : memref<8x36xf32, #tpu.memory_space<vmem>>, vector<8x36xf32>
    %c0_19 = arith.constant 0 : index
    %c0_20 = arith.constant 0 : index
    %47 = vector.load %arg6[%c0_19, %c0_20] : memref<36x256xf32, #tpu.memory_space<vmem>>, vector<36x256xf32>
    %cst_21 = arith.constant dense<0.000000e+00> : vector<8x256xf32>
    %48 = tpu.matmul %46, %47, %cst_21 {dimension_numbers = #tpu.dot_dimension_numbers<[1], [0], [0], [1], [0, 0, 1, 1], [], []>} : vector<8x36xf32>, vector<36x256xf32>, vector<8x256xf32> -> vector<8x256xf32>
    %c0_22 = arith.constant 0 : index
    %c0_23 = arith.constant 0 : index
    %c0_24 = arith.constant 0 : index
    %49 = vector.load %arg3[%c0_22, %c0_23, %c0_24] : memref<1x8x256xf32, #tpu.memory_space<vmem>>, vector<1x8x256xf32>
    %50 = vector.shape_cast %49 : vector<1x8x256xf32> to vector<8x256xf32>
    %51 = vector.shape_cast %48 : vector<8x256xf32> to vector<1x8x256xf32>
    tpu.vector_store %arg3[%c0_22, %c0_23, %c0_24], %51 {strides = array<i32>} : memref<1x8x256xf32, #tpu.memory_space<vmem>>, vector<1x8x256xf32>,
    %cst_25 = arith.constant dense<0.000000e+00> : vector<8xf32>
    %52 = vector.multi_reduction <add>, %48, %cst_25 [1] : vector<8x256xf32> to vector<8xf32>
    %53 = vector.shape_cast %52 : vector<8xf32> to vector<8x1xf32>
    %54 = vector.shape_cast %53 : vector<8x1xf32> to vector<1x8x1xf32>
    %c0_26 = arith.constant 0 : index
    %c0_27 = arith.constant 0 : index
    %c0_28 = arith.constant 0 : index
    %55 = vector.load %arg4[%c0_26, %c0_27, %c0_28] : memref<1x8x1xf32, #tpu.memory_space<vmem>>, vector<1x8x1xf32>
    tpu.vector_store %arg4[%c0_26, %c0_27, %c0_28], %54 {strides = array<i32>} : memref<1x8x1xf32, #tpu.memory_space<vmem>>, vector<1x8x1xf32>,
    %56 = arith.mulf %48, %48 : vector<8x256xf32>
    %cst_29 = arith.constant dense<0.000000e+00> : vector<8xf32>
    %57 = vector.multi_reduction <add>, %56, %cst_29 [1] : vector<8x256xf32> to vector<8xf32>
    %58 = vector.shape_cast %57 : vector<8xf32> to vector<8x1xf32>
    %59 = vector.shape_cast %58 : vector<8x1xf32> to vector<1x8x1xf32>
    %c0_30 = arith.constant 0 : index
    %c0_31 = arith.constant 0 : index
    %c0_32 = arith.constant 0 : index
    %60 = vector.load %arg5[%c0_30, %c0_31, %c0_32] : memref<1x8x1xf32, #tpu.memory_space<vmem>>, vector<1x8x1xf32>
    tpu.vector_store %arg5[%c0_30, %c0_31, %c0_32], %59 {strides = array<i32>} : memref<1x8x1xf32, #tpu.memory_space<vmem>>, vector<1x8x1xf32>,
    return
  }
  func.func @transform_0(%arg0: i32) -> (i32, i32, i32) {
    %c0_i32 = arith.constant 0 : i32
    %c0_i32_0 = arith.constant 0 : i32
    %c0_i32_1 = arith.constant 0 : i32
    return %arg0, %c0_i32, %c0_i32_0 : i32, i32, i32
  }
  func.func @transform_1(%arg0: i32) -> (i32, i32) {
    %c0_i32 = arith.constant 0 : i32
    %c0_i32_0 = arith.constant 0 : i32
    %c0_i32_1 = arith.constant 0 : i32
    return %c0_i32, %c0_i32_0 : i32, i32
  }
  func.func @transform_2(%arg0: i32) -> (i32, i32, i32) {
    %c0_i32 = arith.constant 0 : i32
    %c0_i32_0 = arith.constant 0 : i32
    %c0_i32_1 = arith.constant 0 : i32
    return %arg0, %c0_i32, %c0_i32_0 : i32, i32, i32
  }
  func.func @transform_3(%arg0: i32) -> (i32, i32, i32) {
    %c0_i32 = arith.constant 0 : i32
    %c0_i32_0 = arith.constant 0 : i32
    %c0_i32_1 = arith.constant 0 : i32
    return %arg0, %c0_i32, %c0_i32_0 : i32, i32, i32
  }
  func.func @transform_4(%arg0: i32) -> (i32, i32, i32) {
    %c0_i32 = arith.constant 0 : i32
    %c0_i32_0 = arith.constant 0 : i32
    %c0_i32_1 = arith.constant 0 : i32
    return %arg0, %c0_i32, %c0_i32_0 : i32, i32, i32
  }
}

module attributes {stable_mosaic.version = 11 : i64} {
  func.func @_bn_lrelu_kernel(%arg0: i32, %arg1: memref<16x256xf32, #tpu.memory_space<vmem>>, %arg2: memref<16x1xf32, #tpu.memory_space<vmem>>, %arg3: memref<16x1xf32, #tpu.memory_space<vmem>>, %arg4: memref<16x256xf32, #tpu.memory_space<vmem>>) attributes {dimension_semantics = [#tpu.dimension_semantics<parallel>], iteration_bounds = array<i64: 1>, scalar_prefetch = 0 : i64, scratch_operands = 0 : i64, tpu.core_type = #tpu.core_type<tc>, window_params = [{transform_indices = @transform_0, window_bounds = array<i64: 16, 256>}, {transform_indices = @transform_1, window_bounds = array<i64: 16, 1>}, {transform_indices = @transform_2, window_bounds = array<i64: 16, 1>}, {transform_indices = @transform_3, window_bounds = array<i64: 16, 256>}]} {
    %c0 = arith.constant 0 : index
    %c0_0 = arith.constant 0 : index
    %0 = vector.load %arg1[%c0, %c0_0] : memref<16x256xf32, #tpu.memory_space<vmem>>, vector<16x256xf32>
    %c0_1 = arith.constant 0 : index
    %c0_2 = arith.constant 0 : index
    %1 = vector.load %arg2[%c0_1, %c0_2] : memref<16x1xf32, #tpu.memory_space<vmem>>, vector<16x1xf32>
    %2 = vector.broadcast %1 : vector<16x1xf32> to vector<16x256xf32>
    %3 = arith.mulf %0, %2 : vector<16x256xf32>
    %c0_3 = arith.constant 0 : index
    %c0_4 = arith.constant 0 : index
    %4 = vector.load %arg3[%c0_3, %c0_4] : memref<16x1xf32, #tpu.memory_space<vmem>>, vector<16x1xf32>
    %5 = vector.broadcast %4 : vector<16x1xf32> to vector<16x256xf32>
    %6 = arith.addf %3, %5 : vector<16x256xf32>
    %cst = arith.constant 0.000000e+00 : f32
    %7 = vector.broadcast %cst : f32 to vector<16x256xf32>
    %8 = arith.cmpf oge, %6, %7 : vector<16x256xf32>
    %cst_5 = arith.constant 1.000000e-01 : f32
    %9 = vector.broadcast %cst_5 : f32 to vector<16x256xf32>
    %10 = arith.mulf %9, %6 : vector<16x256xf32>
    %11 = arith.select %8, %6, %10 : vector<16x256xi1>, vector<16x256xf32>
    %c0_6 = arith.constant 0 : index
    %c0_7 = arith.constant 0 : index
    %12 = vector.load %arg4[%c0_6, %c0_7] : memref<16x256xf32, #tpu.memory_space<vmem>>, vector<16x256xf32>
    tpu.vector_store %arg4[%c0_6, %c0_7], %11 {strides = array<i32>} : memref<16x256xf32, #tpu.memory_space<vmem>>, vector<16x256xf32>,
    return
  }
  func.func @transform_0(%arg0: i32) -> (i32, i32) {
    %c0_i32 = arith.constant 0 : i32
    %c0_i32_0 = arith.constant 0 : i32
    return %arg0, %c0_i32 : i32, i32
  }
  func.func @transform_1(%arg0: i32) -> (i32, i32) {
    %c0_i32 = arith.constant 0 : i32
    %c0_i32_0 = arith.constant 0 : i32
    return %arg0, %c0_i32 : i32, i32
  }
  func.func @transform_2(%arg0: i32) -> (i32, i32) {
    %c0_i32 = arith.constant 0 : i32
    %c0_i32_0 = arith.constant 0 : i32
    return %arg0, %c0_i32 : i32, i32
  }
  func.func @transform_3(%arg0: i32) -> (i32, i32) {
    %c0_i32 = arith.constant 0 : i32
    %c0_i32_0 = arith.constant 0 : i32
    return %arg0, %c0_i32 : i32, i32
  }
}

</mosaic_0001>

<bundles_post_ra>
// kernel: tile.18
= control target key start
LH: loop header
LB: loop body
LE: loop exit
PB: predicated region body
PF: predicated region fallthrough
CT: control target
= control target key end

     0   :  { %s22_s0 = inlined_call_operand.vmem [shape: f32[8], index: 0, kind: input, shape index: {}]   ;;  %s23_s1 = inlined_call_operand.vmem [shape: f32[2,8], index: 1, kind: output, shape index: {}]  }
   0x1   :  { %v4_v0 = vld [vmem:[%s22_s0] ss:$0 sm:$0xff] }
   0x2   :  { %5 = vst [vmem:[%s23_s1] sm:$0x3] %v4_v0 }

// kernel: tile.0
= control target key start
LH: loop header
LB: loop body
LE: loop exit
PB: predicated region body
PF: predicated region fallthrough
CT: control target
= control target key end

     0   :  { %s66_s8 = smov 125   ;;  %vm7_vm0 = vcmask 7168   ;;  %s67_s11 = smov 126   ;;  %s117_s0 = inlined_call_operand.vmem [shape: f32[2,8], index: 0, kind: input, shape index: {}]   ;;  %s118_s1 = inlined_call_operand.vmem [shape: f32[16,1], index: 1, kind: output, shape index: {}]  }
   0x1   :  { %v4_v0 = vld [vmem:[%s117_s0] sm:$0x3]  ;;  %s65_s0 = smov 127   ;;  %s68_s12 = smov 124  }
   0x2   :  { %5 = vst [vmem:[#allocation0] sm:$0x3] %v4_v0  ;;  %s69_s13 = smov 123   ;;  %s70_s14 = smov 122  }
   0x3   :  { %s71_s15 = smov 121  }
   0x9   :  { %v9_v1 = vld [vmem:[#allocation0] sm:$0x3]  }
   0xa   :  { %v21_v2 = vld [vmem:[#allocation0] sm:$0x3]   ;;  %10 = vrot.lane.b32.xlu0 %v9_v1, %s65_s0 }
   0xb   :  { %22 = vrot.lane.b32.xlu1 %v21_v2, %s66_s8  ;;  %v15_v3 = vld [vmem:[#allocation0] sm:$0x3]  }
   0xc   :  { %v27_v4 = vld [vmem:[#allocation0] sm:$0x3]  }
   0xd   :  { %v6_v5 = vld [vmem:[#allocation0] sm:$0x3]  }
   0xe   :  { %8 = vst.msk [vmem:[%s118_s1] ss:$8 sm:$0x3] %vm7_vm0, %v6_v5   ;;  %16 = vrot.lane.b32.xlu0 %v15_v3, %s67_s11  ;;  %v33_v6 = vld [vmem:[#allocation0] sm:$0x3]  }
   0xf   :  { %28 = vrot.lane.b32.xlu1 %v27_v4, %s68_s12  ;;  %v39_v7 = vld [vmem:[#allocation0] sm:$0x3]  }
  0x10   :  { %v45_v8 = vld [vmem:[#allocation0] sm:$0x3]  }
  0x12   :  { %34 = vrot.lane.b32.xlu0 %v33_v6, %s69_s13 }
  0x13   :  { %40 = vrot.lane.b32.xlu1 %v39_v7, %s70_s14 }
  0x16   :  { %46 = vrot.lane.b32.xlu0 %v45_v8, %s71_s15 }
  0x7c   :  { %v11_v9 = vpop.permute.xlu0 %10  }
  0x7d   :  { %v23_v10 = vpop.permute.xlu1 %22   ;;  %51 = vst.msk [vmem:[%s118_s1 + $0x1] ss:$8 sm:$0x3] %vm7_vm0, %v11_v9  }
  0x7e   :  { %53 = vst.msk [vmem:[%s118_s1 + $0x3] ss:$8 sm:$0x3] %vm7_vm0, %v23_v10  }
  0x80   :  { %v17_v11 = vpop.permute.xlu0 %16  }
  0x81   :  { %v29_v12 = vpop.permute.xlu1 %28   ;;  %52 = vst.msk [vmem:[%s118_s1 + $0x2] ss:$8 sm:$0x3] %vm7_vm0, %v17_v11  }
  0x82   :  { %54 = vst.msk [vmem:[%s118_s1 + $0x4] ss:$8 sm:$0x3] %vm7_vm0, %v29_v12  }
  0x84   :  { %v35_v13 = vpop.permute.xlu0 %34  }
  0x85   :  { %v41_v14 = vpop.permute.xlu1 %40   ;;  %55 = vst.msk [vmem:[%s118_s1 + $0x5] ss:$8 sm:$0x3] %vm7_vm0, %v35_v13  }
  0x86   :  { %56 = vst.msk [vmem:[%s118_s1 + $0x6] ss:$8 sm:$0x3] %vm7_vm0, %v41_v14  }
  0x88   :  { %v47_v15 = vpop.permute.xlu0 %46  }
  0x89   :  { %57 = vst.msk [vmem:[%s118_s1 + $0x7] ss:$8 sm:$0x3] %vm7_vm0, %v47_v15  }

// kernel: conv_bn_leaky_relu.2
= control target key start
LH: loop header
LB: loop body
LE: loop exit
PB: predicated region body
PF: predicated region fallthrough
CT: control target
= control target key end

     0   :  { %s676_s15 = smov 0   ;;  %s720_s0 = inlined_call_operand.vmem [shape: f32[2,4,256], index: 0, kind: input, shape index: {}]   ;;  %s721_s1 = inlined_call_operand.vmem [shape: f32[8,36], index: 1, kind: input, shape index: {}]   ;;  %s722_s2 = inlined_call_operand.vmem [shape: f32[2,8,256], index: 2, kind: output, shape index: {0}]   ;;  %s723_s3 = inlined_call_operand.vmem [shape: f32[2,8,1], index: 3, kind: output, shape index: {1}]   ;;  %s724_s4 = inlined_call_operand.vmem [shape: f32[2,8,1], index: 4, kind: output, shape index: {2}]  }
   0x1 LB: > { %s589_s16 = sadd.s32 4294967295, %s640_s15   ;;  %p593_p0 = scmp.ge.s32.totalorder %s640_s15, 1  ;;  %s640_s15 = sphi %s676_s15, %s15_s15  }
   0x2   : > { %p167_p1 = scmp.lt.s32.totalorder %s640_s15, 3 }
   0x4   : > { %p168_p2 = pnand %p593_p0, %p167_p1 }
   0x5   : > { %p684_p3 = scmp.lt.s32.totalorder (!%p168_p2), %s589_s16, 1  ;;  %v220_v0 = vlaneseq (!%p168_p2)  ;;  %v642_v1 = vmov (!%p168_p2), 0.0   ;;  %s643_s22 = smov (!%p168_p2), 16   ;;  %vm278_vm4 = vcmask (!%p168_p2), 1043592   ;;  %vm286_vm5 = vcmask (!%p168_p2), 130048   ;;  %v367_v55 = vld [vmem:[%s721_s1] sm:$0xff] (!%p168_p2) }
   0x6   : > { %171 = sbr.rel (%p168_p2) target bundleno = 533 (0x215), region = 28  ;;  %258 = vst [vmem:[#allocation2] sm:$0xff] (!%p168_p2), %v642_v1  ;;  %259 = vst [vmem:[#allocation2 + $0x8] sm:$0xff] (!%p168_p2), %v642_v1  ;;  %453 = vmatprep.mubr.f32.mxu0 (!%p168_p2), %v642_v1  ;;  %s644_s23 = smov (!%p168_p2), 17   ;;  %vm290_vm6 = vcmask (!%p168_p2), 1047684   ;;  %vm303_vm7 = vcmask (!%p168_p2), 1043576  }
   0x7   : > { %260 = vst [vmem:[#allocation2 + $0x10] sm:$0xff] (!%p168_p2), %v642_v1  ;;  %261 = vst [vmem:[#allocation2 + $0x18] sm:$0xff] (!%p168_p2), %v642_v1  ;;  %v221_v2 = vand.u32 (!%p168_p2), 127, %v220_v0  ;;  %s645_s24 = smov (!%p168_p2), 15   ;;  %s646_s25 = smov (!%p168_p2), 1   ;;  %vm299_vm8 = vcmask (!%p168_p2), 121856  }
   0x8   : > { %262 = vst [vmem:[#allocation2 + $0x20] sm:$0xff] (!%p168_p2), %v642_v1  ;;  %263 = vst [vmem:[#allocation2 + $0x28] sm:$0xff] (!%p168_p2), %v642_v1  ;;  %s647_s26 = smov (!%p168_p2), 127   ;;  %s648_s27 = smov (!%p168_p2), 113   ;;  %vm274_vm9 = vcmask (!%p168_p2), 138240   ;;  %vm312_vm10 = vcmask (!%p168_p2), 7168  }
   0x9   : > { %264 = vst [vmem:[#allocation2 + $0x30] sm:$0xff] (!%p168_p2), %v642_v1  ;;  %265 = vst [vmem:[#allocation2 + $0x38] sm:$0xff] (!%p168_p2), %v642_v1  ;;  %v227_v3 = vand.u32 (!%p168_p2), 15, %v221_v2  ;;  %v222_v4 = vadd.s32 (!%p168_p2), 128, %v221_v2  ;;  %s649_s28 = smov (!%p168_p2), 112   ;;  %s650_s29 = smov (!%p168_p2), 111  }
   0xa   : > { %266 = vst [vmem:[#allocation2 + $0x40] sm:$0xf] (!%p168_p2), %v642_v1  ;;  %267 = vst [vmem:[#allocation2 + $0x48] sm:$0xf] (!%p168_p2), %v642_v1  ;;  %vm316_vm11 = vcmask (!%p168_p2), 1047564   ;;  %vm332_vm12 = vcmask (!%p168_p2), 1039364  }
   0xb   : > { %vm254_vm0 = vcmp.lt.s32.totalorder (!%p168_p2), %v227_v3, 15  ;;  %vm247_vm1 = vcmp.ge.s32.totalorder (!%p168_p2), %v227_v3, 1  ;;  %v234_v6 = vand.u32 (!%p168_p2), 15, %v222_v4  ;;  %vm327_vm13 = vcmask (!%p168_p2), 1039360  }
   0xc   : > { %vm343_vm14 = vcmask (!%p168_p2), 920576   ;;  %vm338_vm15 = vcmask (!%p168_p2), 924672  }
   0xd   : > { %s727_s16 = smov (!%p684_p3, %s589_s16), 1  ;;  %vm248_vm2 = vcmp.ge.s32.totalorder %v234_v6, 1  ;;  %vm255_vm3 = vcmp.lt.s32.totalorder %v234_v6, 15 }
   0xe   : > { %s693_s18 = sshll.u32 %s727_s16, 3  ;;  %s606_s6 = sshll.u32 %s727_s16, 4 }
   0xf   : > { %s205_s21 = scalar_lea.vmem %s720_s0, %s693_s18  ;;  %s210_s9 = scalar_lea.vmem %s722_s2, %s606_s6 }
  0x10   : > { %v219_v5 = vld [vmem:[%s205_s21] sm:$0xff]  ;;  %s214_s12 = scalar_lea.vmem %s723_s3, %s693_s18  ;;  %s218_s16 = scalar_lea.vmem %s724_s4, %s693_s18 }
  0x11   : > { %284 = vrot.lane.b32.xlu1 %v219_v5, %s643_s22  ;;  %v256_v7 = vsel %vm254_vm0, %v219_v5, 0.0  ;;  %v281_v8 = vcombine.low %v219_v5, %v219_v5  ;;  %v250_v9 = vcombine.high %v219_v5, %v219_v5  ;;  %319 = vst [vmem:[#allocation2 + $0x20] sm:$0xf] %v219_v5  ;;  %v252_v10 = vsel %vm247_vm1, %v219_v5, 0.0 }
  0x12   : > { %270 = vrot.lane.b32.xlu0 %v256_v7, %s644_s23  ;;  %v306_v14 = vrot.slane %v256_v7, 4  ;;  %v321_v16 = vrot.slane %v252_v10, 4  ;;  %vm354_vm0 = vcmask 916484   ;;  %vm349_vm1 = vcmask 916480  }
  0x13   : > { %320 = vst [vmem:[#allocation2 + $0x28] sm:$0xf] %v250_v9  ;;  %v253_v11 = vsel %vm248_vm2, %v250_v9, 0.0  ;;  %v257_v12 = vsel %vm255_vm3, %v250_v9, 0.0  ;;  %vm365_vm2 = vcmask 904192   ;;  %vm360_vm3 = vcmask 908288  }
  0x14   : > { %v307_v13 = vrot.slane %v257_v12, 4  ;;  %v322_v15 = vrot.slane %v253_v11, 4 }
  0x15   : > { %282 = vrot.lane.b32.xlu1 %v281_v8, %s643_s22 }
  0x16   : > { %295 = vrot.lane.b32.xlu0 %v252_v10, %s645_s24 }
  0x19   : > { %297 = vrot.lane.b32.xlu1 %v253_v11, %s645_s24 }
  0x1a   : > { %272 = vrot.lane.b32.xlu0 %v257_v12, %s644_s23 }
  0x1d   : > { %310 = vrot.lane.b32.xlu1 %v307_v13, %s646_s25 }
  0x1e   : > { %308 = vrot.lane.b32.xlu0 %v306_v14, %s646_s25 }
  0x21   : > { %325 = vrot.lane.b32.xlu1 %v322_v15, %s647_s26 }
  0x22   : > { %323 = vrot.lane.b32.xlu0 %v321_v16, %s647_s26 }
  0x25   : > { %336 = vrot.lane.b32.xlu1 %v257_v12, %s648_s27 }
  0x26   : > { %334 = vrot.lane.b32.xlu0 %v256_v7, %s648_s27 }
  0x29   : > { %347 = vrot.lane.b32.xlu1 %v219_v5, %s649_s28 }
  0x2a   : > { %345 = vrot.lane.b32.xlu0 %v281_v8, %s649_s28 }
  0x2d   : > { %358 = vrot.lane.b32.xlu1 %v253_v11, %s650_s29 }
  0x2e   : > { %356 = vrot.lane.b32.xlu0 %v252_v10, %s650_s29 }
  0x83   : > { %v285_v17 = vpop.permute.xlu1 %284 }
  0x84   : > { %v271_v18 = vpop.permute.xlu0 %270 }
  0x85   : > { %279 = vst.msk [vmem:[#allocation2] sm:$0xf] %vm278_vm4, %v271_v18  ;;  %vm382_vm4 = vcmask 1043456  }
  0x87   : > { %v283_v19 = vpop.permute.xlu1 %282 }
  0x88   : > { %v287_v20 = vsel %vm286_vm5, %v283_v19, %v285_v17  ;;  %291 = vst.msk [vmem:[#allocation2] sm:$0xf0] %vm290_vm6, %v283_v19  ;;  %v296_v21 = vpop.permute.xlu0 %295  ;;  %vm378_vm5 = vcmask 293888  }
  0x89   : > { %292 = vst [vmem:[#allocation2 + $0x8] sm:$0xf0] %v287_v20  ;;  %304 = vst.msk [vmem:[#allocation2 + $0x10] sm:$0xf] %vm303_vm7, %v296_v21 }
  0x8b   : > { %v298_v22 = vpop.permute.xlu1 %297 }
  0x8c   : > { %v300_v23 = vsel %vm299_vm8, %v296_v21, %v298_v22  ;;  %v273_v24 = vpop.permute.xlu0 %272 }
  0x8d   : > { %305 = vst [vmem:[#allocation2 + $0x18] sm:$0xf] %v300_v23  ;;  %v275_v25 = vsel %vm274_vm9, %v271_v18, %v273_v24 }
  0x8e   : > { %280 = vst [vmem:[#allocation2 + $0x8] sm:$0xf] %v275_v25 }
  0x8f   : > { %v311_v26 = vpop.permute.xlu1 %310  ;;  %v368_v39 = vld [vmem:[#allocation2] sm:$0xff] }
  0x90   : > { %v309_v27 = vpop.permute.xlu0 %308 }
  0x91   : > { %v313_v28 = vsel %vm312_vm10, %v309_v27, %v311_v26  ;;  %317 = vst.msk [vmem:[#allocation2 + $0x10] sm:$0xf0] %vm316_vm11, %v309_v27 }
  0x92   : > { %318 = vst [vmem:[#allocation2 + $0x18] sm:$0xf0] %v313_v28 }
  0x93   : > { %v326_v29 = vpop.permute.xlu1 %325 }
  0x94   : > { %333 = vst.msk [vmem:[#allocation2 + $0x28] sm:$0xf0] %vm332_vm12, %v326_v29  ;;  %v324_v30 = vpop.permute.xlu0 %323 }
  0x95   : > { %v328_v31 = vsel %vm327_vm13, %v324_v30, %v326_v29  ;;  %v369_v36 = vld [vmem:[#allocation2 + $0x8] sm:$0xff] }
  0x96   : > { %331 = vst [vmem:[#allocation2 + $0x20] sm:$0xf0] %v328_v31 }
  0x97   : > { %v337_v32 = vpop.permute.xlu1 %336 }
  0x98   : > { %344 = vst.msk [vmem:[#allocation2 + $0x38] sm:$0xf] %vm343_vm14, %v337_v32  ;;  %v335_v33 = vpop.permute.xlu0 %334  ;;  %v370_v34 = vld [vmem:[#allocation2 + $0x10] sm:$0xff] }
  0x99   : > { %v339_v35 = vsel %vm338_vm15, %v335_v33, %v337_v32  ;;  %v371_v37 = vld [vmem:[#allocation2 + $0x18] sm:$0xff]  ;;  %v609_v41 = vpack.c.bf16 %v370_v34, %v368_v39 }
  0x9a   : > { %342 = vst [vmem:[#allocation2 + $0x30] sm:$0xf] %v339_v35  ;;  %v607_v38 = vpack.c.bf16 %v371_v37, %v369_v36 }
  0x9b   : > { %v348_v40 = vpop.permute.xlu1 %347  ;;  %v373_v47 = vld [vmem:[#allocation2 + $0x28] sm:$0xff] }
  0x9c   : > { %355 = vst.msk [vmem:[#allocation2 + $0x38] sm:$0xf0] %vm354_vm0, %v348_v40  ;;  %v346_v42 = vpop.permute.xlu0 %345  ;;  %608 = vmatprep.subr.bf16.mxu0 %v607_v38 }
  0x9d   : > { %v350_v43 = vsel %vm349_vm1, %v346_v42, %v348_v40  ;;  %610 = vmatpush1.bf16.msra.mxu0 %v609_v41  ;;  %v372_v50 = vld [vmem:[#allocation2 + $0x20] sm:$0xff] }
  0x9e   : > { %353 = vst [vmem:[#allocation2 + $0x30] sm:$0xf0] %v350_v43 }
  0x9f   : > { %v359_v44 = vpop.permute.xlu1 %358 }
  0xa0   : > { %v357_v45 = vpop.permute.xlu0 %356  ;;  %366 = vst.msk [vmem:[#allocation2 + $0x48] sm:$0xf] %vm365_vm2, %v359_v44 }
  0xa1   : > { %v361_v46 = vsel %vm360_vm3, %v357_v45, %v359_v44 }
  0xa2   : > { %364 = vst [vmem:[#allocation2 + $0x40] sm:$0xf] %v361_v46 }
  0xa3   : > { %v375_v48 = vld [vmem:[#allocation2 + $0x38] sm:$0xff] }
  0xa4   : > { %v611_v49 = vpack.c.bf16 %v375_v48, %v373_v47 }
  0xa5   : > { %v374_v51 = vld [vmem:[#allocation2 + $0x30] sm:$0xff] }
  0xa6   : > { %612 = vmatprep.subr.bf16.mxu0 %v611_v49  ;;  %v613_v52 = vpack.c.bf16 %v374_v51, %v372_v50 }
  0xa7   : > { %v377_v53 = vld [vmem:[#allocation2 + $0x48] sm:$0xf] }
  0xa8   : > { %614 = vmatpush1.bf16.msra.mxu0 %v613_v52 }
  0xa9   : > { %600 = vmatprep.subr.msk.mxu0 %vm382_vm4, %v377_v53  ;;  %v376_v54 = vld [vmem:[#allocation2 + $0x40] sm:$0xf] }
  0xac   : > { %601 = vmatpush1.msk.msra.mxu0 %vm382_vm4, %v376_v54 }
  0xad   : > { %602 = vmatmul.mubr.msk.f32.vlgmr.msra.gmra.mrb[0].mxu0 %vm378_vm5, %v367_v55 }
 0x180   : > { %v455_v56 = vpop.f32.mrb[0].mxu0 }
 0x181   : > { %v457_v57 = vpop.f32.mrb[1].mxu0  ;;  %460 = vst [vmem:[%s210_s9] sm:$0xff] %v455_v56  ;;  %v466_v58 = vmul.f32 %v455_v56, %v455_v56 }
 0x182   : > { %461 = vst [vmem:[%s210_s9 + $0x8] sm:$0xff] %v457_v57  ;;  %v467_v59 = vmul.f32 %v457_v57, %v457_v57  ;;  %v462_v60 = vadd.f32 %v457_v57, %v455_v56 }
 0x184   : > { %463 = vadd.xlane.f32.xlu0 %v462_v60  ;;  %v468_v61 = vadd.f32 %v467_v59, %v466_v58 }
 0x186   : > { %469 = vadd.xlane.f32.xlu1 %v468_v61 }
 0x211   : > { %v464_v62 = vpop.xlane.xlu0 %463 }
 0x212   : > { %465 = vst.msk [vmem:[%s214_s12] sm:$0xff] %vm312_vm10, %v464_v62 }
 0x213   : > { %v470_v63 = vpop.xlane.xlu1 %469 }
 0x214   : > { %471 = vst.msk [vmem:[%s218_s16] sm:$0xff] %vm312_vm10, %v470_v63 }
 0x215 PF: > { %s15_s15 = sadd.s32 1, %s640_s15  }
 0x216   : > { %p12_p4 = scmp.ge.s32.totalorder %s15_s15, 4  }
 0x218   :  { %14 = sbr.rel (!%p12_p4) target bundleno = 1 (0x1), region = 82 }

// kernel: conv_bn_leaky_relu.3
= control target key start
LH: loop header
LB: loop body
LE: loop exit
PB: predicated region body
PF: predicated region fallthrough
CT: control target
= control target key end

     0   :  { %v73_v0 = vmov 0   ;;  %s130_s2 = inlined_call_operand.vmem [shape: f32[16,1], index: 2, kind: input, shape index: {}]   ;;  %s131_s1 = inlined_call_operand.vmem [shape: f32[16,1], index: 1, kind: input, shape index: {}]   ;;  %s132_s0 = inlined_call_operand.vmem [shape: f32[16,256], index: 0, kind: input, shape index: {}, may-alias: {0,3}]   ;;  %s133_s3 = inlined_call_operand.vmem [shape: f32[16,256], index: 3, kind: output, shape index: {}, may-alias: {0,3}]  }
   0x1   :  { %72 = vset.pattern.permute.xlu1 %v73_v0  ;;  %71 = vset.pattern.permute.xlu0 %v73_v0  ;;  %v34_v1 = vld [vmem:[%s130_s2] sm:$0xff]  ;;  %v35_v3 = vld [vmem:[%s130_s2 + $0x8] sm:$0xff]  ;;  %v16_v13 = vld [vmem:[%s132_s0 + $0x10] sm:$0xff] }
   0x2   :  { %v18_v2 = vld [vmem:[%s131_s1] sm:$0xff]  ;;  %38 = vperm.xlu1 %72, %v34_v1   ;;  %v19_v4 = vld [vmem:[%s131_s1 + $0x8] sm:$0xff]  ;;  %v17_v14 = vld [vmem:[%s132_s0 + $0x18] sm:$0xff] }
   0x3   :  { %22 = vperm.xlu0 %71, %v18_v2   ;;  %v14_v5 = vld [vmem:[%s132_s0] sm:$0xff]  ;;  %v15_v6 = vld [vmem:[%s132_s0 + $0x8] sm:$0xff] }
   0x6   :  { %43 = vperm.xlu1 %72, %v35_v3  }
   0x7   :  { %27 = vperm.xlu0 %71, %v19_v4  }
  0x81   :  { %v39_v8 = vpop.permute.xlu1 %38 }
  0x82   :  { %v23_v7 = vpop.permute.xlu0 %22 }
  0x83   :  { %v30_v9 = vmul.f32 %v23_v7, %v14_v5  ;;  %v31_v10 = vmul.f32 %v23_v7, %v15_v6 }
  0x85   :  { %v46_v11 = vadd.f32 %v39_v8, %v30_v9  ;;  %v47_v12 = vadd.f32 %v39_v8, %v31_v10  ;;  %v44_v22 = vpop.permute.xlu1 %43 }
  0x86   :  { %v28_v15 = vpop.permute.xlu0 %27 }
  0x87   :  { %vm50_vm0 = vcmp.ge.f32.partialorder %v46_v11, 0.0  ;;  %vm51_vm1 = vcmp.ge.f32.partialorder %v47_v12, 0.0  ;;  %v54_v16 = vmul.f32 0.1, %v46_v11  ;;  %v55_v17 = vmul.f32 0.1, %v47_v12 }
  0x88   :  { %v32_v18 = vmul.f32 %v28_v15, %v16_v13  ;;  %v33_v19 = vmul.f32 %v28_v15, %v17_v14 }
  0x89   :  { %v58_v20 = vsel %vm50_vm0, %v46_v11, %v54_v16  ;;  %v59_v21 = vsel %vm51_vm1, %v47_v12, %v55_v17 }
  0x8a   :  { %62 = vst [vmem:[%s133_s3] sm:$0xff] %v58_v20  ;;  %63 = vst [vmem:[%s133_s3 + $0x8] sm:$0xff] %v59_v21  ;;  %v48_v23 = vadd.f32 %v44_v22, %v32_v18  ;;  %v49_v24 = vadd.f32 %v44_v22, %v33_v19 }
  0x8c   :  { %vm52_vm2 = vcmp.ge.f32.partialorder %v48_v23, 0.0  ;;  %vm53_vm3 = vcmp.ge.f32.partialorder %v49_v24, 0.0  ;;  %v56_v25 = vmul.f32 0.1, %v48_v23  ;;  %v57_v26 = vmul.f32 0.1, %v49_v24 }
  0x8e   :  { %v60_v27 = vsel %vm52_vm2, %v48_v23, %v56_v25  ;;  %v61_v28 = vsel %vm53_vm3, %v49_v24, %v57_v26 }
  0x8f   :  { %64 = vst [vmem:[%s133_s3 + $0x10] sm:$0xff] %v60_v27  ;;  %65 = vst [vmem:[%s133_s3 + $0x18] sm:$0xff] %v61_v28 }

</bundles_post_ra>
